<compile_context>
chip_gen: v7x
topology: tpu7x:2x2x1
jax: 0.10.0
libtpu: 0.0.40
codegen_flags: <defaults>
</compile_context>

<pallas_src>
import jax
import jax.numpy as jnp
from jax.experimental import pallas as pl
from jax.experimental.pallas import tpu as pltpu


def _bahdanau_kernel(q_ref, k_ref, ua_wt_ref, ua_b_ref, va_w_ref, va_b_ref,
                     ctx_ref, sc_ref):
    # q_ref:     (TB, H)       query rows, lane-dense
    # k_ref:     (TB, S, H)    keys (S already padded to a multiple of 8)
    # ua_wt_ref: (H, H)        Ua.weight pre-transposed to (in, out), bf16
    # ua_b_ref:  (1, H)        f32
    # va_w_ref:  (1, H)        Va.weight as a row, f32
    # va_b_ref:  (1, 1)        f32
    # ctx_ref:   (TB, H)       lane-dense context
    # sc_ref:    (TB, S)       lane-dense scores
    TB, S, H = k_ref.shape

    q = q_ref[...]                                   # (TB, H)    f32
    k = k_ref[...]                                   # (TB, S, H) f32

    # query + keys, query broadcast over the sequence axis.
    x = q[:, None, :] + k                            # (TB, S, H) f32

    # Ua projection: one fused (TB*S, H) x (H, H) MXU matmul in bf16 with f32
    # accumulation.  S % 8 == 0 (wrapper pads), so the reshapes are free views.
    x2 = x.reshape(TB * S, H).astype(jnp.bfloat16)
    h = jnp.dot(x2, ua_wt_ref[...], preferred_element_type=jnp.float32)
    h = jnp.tanh(h + ua_b_ref[...])                  # (TB*S, H) f32 tanh (v5e-safe)
    h = h.reshape(TB, S, H)

    # Va projection (N = 1): VPU multiply + lane reduce -> lane-dense (TB, S).
    scores = jnp.sum(h * va_w_ref[...], axis=-1) + va_b_ref[...]   # (TB, S)
    sc_ref[...] = scores                             # dense store, no masked vst

    # context = scores @ keys (no softmax, exactly as the reference module).
    # Batched (1, S) x (S, H) matmuls on the otherwise-idle MXU.
    ctx = jnp.einsum(
        "bqs,bsh->bqh",
        scores[:, None, :].astype(jnp.bfloat16),
        k.astype(jnp.bfloat16),
        preferred_element_type=jnp.float32)          # (TB, 1, H) f32
    ctx_ref[...] = ctx.reshape(TB, H)                # dense (TB, H) store


def _choose_tiling(B, S_pad, H, vmem_budget=28 << 20):
    """Pick (TB, B_padded) with B_padded % TB == 0.

    Rough per-step VMEM (bytes): double-buffered keys/query/outputs (f32),
    bf16 x + f32 h intermediates, and the double-buffered bf16 Ua weight.
    Budget is conservative so the same choice fits v7x's 64 MiB VMEM while
    still using a healthy chunk of v5e/v6e's 128 MiB.
    """
    per_row = 20 * S_pad * H + 16 * H + 8 * S_pad + 256
    fixed = 4 * H * H + 16 * H + 4096
    cap = max(1, (vmem_budget - fixed) // per_row)

    if B <= 8 or cap < 8:
        tb = max(1, min(B, cap))
        bp = ((B + tb - 1) // tb) * tb
        return tb, bp

    cap = (cap // 8) * 8                              # sublane-dense batch tiles
    bp = ((B + 7) // 8) * 8                           # pad batch to a sublane multiple
    cands = [t for t in range(8, bp + 1, 8) if bp % t == 0 and t <= cap]
    multi = [t for t in cands if bp // t >= 2]        # >= 2 grid steps (v7x: 2 TCs)
    tb = max(multi) if multi else (max(cands) if cands else 8)
    return tb, bp


def bahdanau_attention(query, keys, ua_w, ua_b, va_w, va_b):
    B, one, H = query.shape
    assert one == 1
    S = keys.shape[1]

    S_pad = max(8, ((S + 7) // 8) * 8)                # keep reshapes free views
    TB, Bp = _choose_tiling(B, S_pad, H)

    # Hoist all relayouts / casts / padding out of the kernel (one-time XLA ops).
    q2 = query.reshape(B, H).astype(jnp.float32)      # lane-dense query rows
    k3 = keys.astype(jnp.float32)
    if S_pad != S:
        k3 = jnp.pad(k3, ((0, 0), (0, S_pad - S), (0, 0)))   # zero keys: no ctx effect
    if Bp != B:
        q2 = jnp.pad(q2, ((0, Bp - B), (0, 0)))
        k3 = jnp.pad(k3, ((0, Bp - B), (0, 0), (0, 0)))

    ua_wt = ua_w.T.astype(jnp.bfloat16)               # (H_in, H_out) MXU operand
    ua_b2 = ua_b.reshape(1, H).astype(jnp.float32)
    va_w2 = va_w.reshape(1, H).astype(jnp.float32)
    va_b2 = va_b.reshape(1, 1).astype(jnp.float32)

    grid = (Bp // TB,)
    grid_spec = pltpu.PrefetchScalarGridSpec(
        num_scalar_prefetch=0,
        grid=grid,
        in_specs=[
            pl.BlockSpec((TB, H), lambda b: (b, 0)),          # query rows
            pl.BlockSpec((TB, S_pad, H), lambda b: (b, 0, 0)),  # keys
            pl.BlockSpec((H, H), lambda b: (0, 0)),           # Ua.weight^T (bf16)
            pl.BlockSpec((1, H), lambda b: (0, 0)),           # Ua.bias
            pl.BlockSpec((1, H), lambda b: (0, 0)),           # Va.weight row
            pl.BlockSpec((1, 1), lambda b: (0, 0)),           # Va.bias
        ],
        out_specs=[
            pl.BlockSpec((TB, H), lambda b: (b, 0)),          # context (lane-dense)
            pl.BlockSpec((TB, S_pad), lambda b: (b, 0)),      # scores  (lane-dense)
        ],
    )

    ctx2, sc2 = pl.pallas_call(
        _bahdanau_kernel,
        grid_spec=grid_spec,
        out_shape=(
            jax.ShapeDtypeStruct((Bp, H), jnp.float32),
            jax.ShapeDtypeStruct((Bp, S_pad), jnp.float32),
        ),
        compiler_params=pltpu.CompilerParams(
            dimension_semantics=("parallel",),
            vmem_limit_bytes=48 * 1024 * 1024),
    )(q2, k3, ua_wt, ua_b2, va_w2, va_b2)

    context = ctx2[:B].reshape(B, 1, H)
    scores = sc2[:B, :S].reshape(B, 1, S)
    return context, scores


def _reference(query, keys, ua_w, ua_b, va_w, va_b):
    x = query + keys                                     # (B, S, H)
    h = jnp.tanh(jnp.einsum("bsh,oh->bso", x, ua_w) + ua_b)
    s = jnp.einsum("bsh,oh->bso", h, va_w) + va_b        # (B, S, 1)
    scores = jnp.transpose(s, (0, 2, 1))                 # (B, 1, S)
    context = jnp.matmul(scores, keys)                   # (B, 1, H)
    return context, scores


def _run_case(key, B, S, H):
    k_q, k_k, k_uw, k_ub, k_vw, k_vb = jax.random.split(key, 6)
    query = jax.random.normal(k_q, (B, 1, H), dtype=jnp.float32)
    keys = jax.random.normal(k_k, (B, S, H), dtype=jnp.float32)

    # nn.Linear-style init (weight (out, in), bias (out,))
    bound = 1.0 / jnp.sqrt(H)
    ua_w = jax.random.uniform(k_uw, (H, H), jnp.float32, -bound, bound)
    ua_b = jax.random.uniform(k_ub, (H,), jnp.float32, -bound, bound)
    va_w = jax.random.uniform(k_vw, (1, H), jnp.float32, -bound, bound)
    va_b = jax.random.uniform(k_vb, (1,), jnp.float32, -bound, bound)

    context, scores = bahdanau_attention(query, keys, ua_w, ua_b, va_w, va_b)
    jax.block_until_ready((context, scores))

    ctx_ref, sc_ref = _reference(query, keys, ua_w, ua_b, va_w, va_b)
    # bf16 MXU operands (f32 accumulation) -> relaxed tolerance vs f32 reference.
    assert jnp.allclose(context, ctx_ref, atol=3e-2, rtol=3e-2)
    assert jnp.allclose(scores, sc_ref, atol=3e-2, rtol=3e-2)


if __name__ == "__main__":
    root = jax.random.PRNGKey(0)
    k0, k1 = jax.random.split(root)

    # Primary small case (matches the module's intended layout).
    _run_case(k0, B=2, S=8, H=32)
    # Awkward shapes to exercise the sequence-padding path.
    _run_case(k1, B=3, S=7, H=32)

    print("KERNEL_OK")
</pallas_src>

<mosaic_0001>
module attributes {stable_mosaic.version = 11 : i64} {
  func.func @_bahdanau_kernel(%arg0: i32, %arg1: memref<2x32xf32, #tpu.memory_space<vmem>>, %arg2: memref<2x8x32xf32, #tpu.memory_space<vmem>>, %arg3: memref<32x32xbf16, #tpu.memory_space<vmem>>, %arg4: memref<1x32xf32, #tpu.memory_space<vmem>>, %arg5: memref<1x32xf32, #tpu.memory_space<vmem>>, %arg6: memref<1x1xf32, #tpu.memory_space<vmem>>, %arg7: memref<2x32xf32, #tpu.memory_space<vmem>>, %arg8: memref<2x8xf32, #tpu.memory_space<vmem>>) attributes {dimension_semantics = [#tpu.dimension_semantics<parallel>], iteration_bounds = array<i64: 1>, scalar_prefetch = 0 : i64, scratch_operands = 0 : i64, tpu.core_type = #tpu.core_type<tc>, window_params = [{transform_indices = @transform_0, window_bounds = array<i64: 2, 32>}, {transform_indices = @transform_1, window_bounds = array<i64: 2, 8, 32>}, {pipeline_mode = #tpu.pipeline_mode<synchronous>, transform_indices = @transform_2, window_bounds = array<i64: 32, 32>}, {pipeline_mode = #tpu.pipeline_mode<synchronous>, transform_indices = @transform_3, window_bounds = array<i64: 1, 32>}, {pipeline_mode = #tpu.pipeline_mode<synchronous>, transform_indices = @transform_4, window_bounds = array<i64: 1, 32>}, {pipeline_mode = #tpu.pipeline_mode<synchronous>, transform_indices = @transform_5, window_bounds = array<i64: 1, 1>}, {transform_indices = @transform_6, window_bounds = array<i64: 2, 32>}, {transform_indices = @transform_7, window_bounds = array<i64: 2, 8>}]} {
    %c0 = arith.constant 0 : index
    %c0_0 = arith.constant 0 : index
    %0 = vector.load %arg1[%c0, %c0_0] : memref<2x32xf32, #tpu.memory_space<vmem>>, vector<2x32xf32>
    %c0_1 = arith.constant 0 : index
    %c0_2 = arith.constant 0 : index
    %c0_3 = arith.constant 0 : index
    %1 = vector.load %arg2[%c0_1, %c0_2, %c0_3] : memref<2x8x32xf32, #tpu.memory_space<vmem>>, vector<2x8x32xf32>
    %2 = vector.shape_cast %0 : vector<2x32xf32> to vector<2x1x32xf32>
    %3 = vector.broadcast %2 : vector<2x1x32xf32> to vector<2x8x32xf32>
    %4 = arith.addf %3, %1 : vector<2x8x32xf32>
    %5 = vector.shape_cast %4 : vector<2x8x32xf32> to vector<16x32xf32>
    %6 = arith.truncf %5 : vector<16x32xf32> to vector<16x32xbf16>
    %c0_4 = arith.constant 0 : index
    %c0_5 = arith.constant 0 : index
    %7 = vector.load %arg3[%c0_4, %c0_5] : memref<32x32xbf16, #tpu.memory_space<vmem>>, vector<32x32xbf16>
    %cst = arith.constant dense<0.000000e+00> : vector<16x32xf32>
    %8 = tpu.matmul %6, %7, %cst {dimension_numbers = #tpu.dot_dimension_numbers<[1], [0], [0], [1], [0, 0, 1, 1], [], []>} : vector<16x32xbf16>, vector<32x32xbf16>, vector<16x32xf32> -> vector<16x32xf32>
    %c0_6 = arith.constant 0 : index
    %c0_7 = arith.constant 0 : index
    %9 = vector.load %arg4[%c0_6, %c0_7] : memref<1x32xf32, #tpu.memory_space<vmem>>, vector<1x32xf32>
    %10 = vector.broadcast %9 : vector<1x32xf32> to vector<16x32xf32>
    %11 = arith.addf %8, %10 : vector<16x32xf32>
    %12 = math.tanh %11 : vector<16x32xf32>
    %13 = vector.shape_cast %12 : vector<16x32xf32> to vector<2x8x32xf32>
    %c0_8 = arith.constant 0 : index
    %c0_9 = arith.constant 0 : index
    %14 = vector.load %arg5[%c0_8, %c0_9] : memref<1x32xf32, #tpu.memory_space<vmem>>, vector<1x32xf32>
    %15 = vector.shape_cast %14 : vector<1x32xf32> to vector<1x1x32xf32>
    %16 = vector.broadcast %15 : vector<1x1x32xf32> to vector<2x8x32xf32>
    %17 = arith.mulf %13, %16 : vector<2x8x32xf32>
    %cst_10 = arith.constant dense<0.000000e+00> : vector<2x8xf32>
    %18 = vector.multi_reduction <add>, %17, %cst_10 [2] : vector<2x8x32xf32> to vector<2x8xf32>
    %c0_11 = arith.constant 0 : index
    %c0_12 = arith.constant 0 : index
    %19 = vector.load %arg6[%c0_11, %c0_12] : memref<1x1xf32, #tpu.memory_space<vmem>>, vector<1x1xf32>
    %20 = vector.broadcast %19 : vector<1x1xf32> to vector<2x8xf32>
    %21 = arith.addf %18, %20 : vector<2x8xf32>
    %c0_13 = arith.constant 0 : index
    %c0_14 = arith.constant 0 : index
    %22 = vector.load %arg8[%c0_13, %c0_14] : memref<2x8xf32, #tpu.memory_space<vmem>>, vector<2x8xf32>
    tpu.vector_store %arg8[%c0_13, %c0_14], %21 {strides = array<i32>} : memref<2x8xf32, #tpu.memory_space<vmem>>, vector<2x8xf32>,
    %23 = vector.shape_cast %21 : vector<2x8xf32> to vector<2x1x8xf32>
    %24 = arith.truncf %23 : vector<2x1x8xf32> to vector<2x1x8xbf16>
    %25 = arith.truncf %1 : vector<2x8x32xf32> to vector<2x8x32xbf16>
    "tpu.trace_start"() <{level = 10 : i32, message = "bqs,bsh->bqh"}> : () -> ()
    %cst_15 = arith.constant dense<0.000000e+00> : vector<2x1x32xf32>
    %26 = tpu.matmul %24, %25, %cst_15 {dimension_numbers = #tpu.dot_dimension_numbers<[2], [1], [1], [2], [0, 0, 0, 1, 1, 2], [0], [0]>} : vector<2x1x8xbf16>, vector<2x8x32xbf16>, vector<2x1x32xf32> -> vector<2x1x32xf32>
    "tpu.trace_stop"() : () -> ()
    %27 = vector.shape_cast %26 : vector<2x1x32xf32> to vector<2x32xf32>
    %c0_16 = arith.constant 0 : index
    %c0_17 = arith.constant 0 : index
    %28 = vector.load %arg7[%c0_16, %c0_17] : memref<2x32xf32, #tpu.memory_space<vmem>>, vector<2x32xf32>
    tpu.vector_store %arg7[%c0_16, %c0_17], %27 {strides = array<i32>} : memref<2x32xf32, #tpu.memory_space<vmem>>, vector<2x32xf32>,
    return
  }
  func.func @transform_0(%arg0: i32) -> (i32, i32) {
    %c0_i32 = arith.constant 0 : i32
    %c0_i32_0 = arith.constant 0 : i32
    return %arg0, %c0_i32 : i32, i32
  }
  func.func @transform_1(%arg0: i32) -> (i32, i32, i32) {
    %c0_i32 = arith.constant 0 : i32
    %c0_i32_0 = arith.constant 0 : i32
    %c0_i32_1 = arith.constant 0 : i32
    return %arg0, %c0_i32, %c0_i32_0 : i32, i32, i32
  }
  func.func @transform_2(%arg0: i32) -> (i32, i32) {
    %c0_i32 = arith.constant 0 : i32
    %c0_i32_0 = arith.constant 0 : i32
    %c0_i32_1 = arith.constant 0 : i32
    return %c0_i32, %c0_i32_0 : i32, i32
  }
  func.func @transform_3(%arg0: i32) -> (i32, i32) {
    %c0_i32 = arith.constant 0 : i32
    %c0_i32_0 = arith.constant 0 : i32
    %c0_i32_1 = arith.constant 0 : i32
    return %c0_i32, %c0_i32_0 : i32, i32
  }
  func.func @transform_4(%arg0: i32) -> (i32, i32) {
    %c0_i32 = arith.constant 0 : i32
    %c0_i32_0 = arith.constant 0 : i32
    %c0_i32_1 = arith.constant 0 : i32
    return %c0_i32, %c0_i32_0 : i32, i32
  }
  func.func @transform_5(%arg0: i32) -> (i32, i32) {
    %c0_i32 = arith.constant 0 : i32
    %c0_i32_0 = arith.constant 0 : i32
    %c0_i32_1 = arith.constant 0 : i32
    return %c0_i32, %c0_i32_0 : i32, i32
  }
  func.func @transform_6(%arg0: i32) -> (i32, i32) {
    %c0_i32 = arith.constant 0 : i32
    %c0_i32_0 = arith.constant 0 : i32
    return %arg0, %c0_i32 : i32, i32
  }
  func.func @transform_7(%arg0: i32) -> (i32, i32) {
    %c0_i32 = arith.constant 0 : i32
    %c0_i32_0 = arith.constant 0 : i32
    return %arg0, %c0_i32 : i32, i32
  }
}

</mosaic_0001>

<bundles_post_ra>
// kernel: tpu_custom_call.1
= control target key start
LH: loop header
LB: loop body
LE: loop exit
PB: predicated region body
PF: predicated region fallthrough
CT: control target
= control target key end

     0   :  { %s640_s0 = inlined_call_operand.vmem [shape: f32[2,32], index: 0, kind: input, shape index: {}]   ;;  %s641_s1 = inlined_call_operand.hbm [shape: f32[2,8,32], index: 1, kind: input, shape index: {}]   ;;  %s642_s2 = inlined_call_operand.hbm [shape: bf16[32,32], index: 2, kind: input, shape index: {}]   ;;  %s643_s3 = inlined_call_operand.vmem [shape: f32[1,32], index: 3, kind: input, shape index: {}]   ;;  %s644_s4 = inlined_call_operand.vmem [shape: f32[1,32], index: 4, kind: input, shape index: {}]   ;;  %s645_s5 = inlined_call_operand.<no memory space> [shape: f32[1,1], index: 5, kind: input, shape index: {}]   ;;  %s646_s6 = inlined_call_operand.hbm [shape: f32[2,32], index: 6, kind: output, shape index: {0}]   ;;  %s647_s7 = inlined_call_operand.hbm [shape: f32[2,8], index: 7, kind: output, shape index: {1}]  }
   0x1   :  { %v13_v0 = vstv %s645_s5 }
   0x2   :  { %14 = vst [vmem:[#allocation2] sm:$0x1] %v13_v0 }
   0x3   :  { %15 = vsyncpa [#allocation4], 0 }
   0x4   :  { %16 = vsyncpa [#allocation7], 0 }
   0x5   :  { %17 = vsyncpa [#allocation5], 0 }
   0x6   :  { %18 = vsyncpa [#allocation10], 0  ;;  %s511_s26 = smov [#allocation3]   ;;  %s415_s30 = scalar_lea.hbm %s641_s1, 256 }
   0x7   :  { %s26_s27 = sshll.u32 %s511_s26, 4  ;;  %p416_p0 = scmp.ne.s32.totalorder %s641_s1, %s415_s30  ;;  %s27_s27 = int_to_ptr.vmem [resolvable:$true] %s26_s27 }
   0x8   :  { %p419_p1 = scmp.lt.u32.totalorder %s415_s30, %s641_s1 }
   0xa   :  { %p421_p2 = pnand %p419_p1, %p416_p0 }
   0xc   :  { %424 = shalt.err (!%p421_p2)
}
   0xd   :  { %s425_s5 = scalar_lea.vmem %s27_s27, 256  ;;  %p430_p4 = scmp.lt.s32.totalorder %s27_s27, %s27_s27 }
   0xe   :  { %p426_p3 = scmp.ne.s32.totalorder %s27_s27, %s425_s5  ;;  %p431_p5 = scmp.lt.s32.totalorder %s425_s5, %s425_s5 }
  0x10   :  { %p432_p6 = por %p431_p5, %p430_p4 }
  0x12   :  { %p433_p7 = pnand %p432_p6, %p426_p3 }
  0x14   :  { %436 = shalt.err (!%p433_p7)
}
  0x15   :  { %s512_s12 = smov 128   ;;  %s513_s13 = smov 8  }
  0x16   :  { %32 = dma.hbm_to_vmem [thread:$0]  %s641_s1, 256, %s27_s27, [#allocation4], %s512_s12, %s512_s12, %s513_s13  }
  0x17   :  { %s514_s16 = smov [#allocation6]   ;;  %s437_s20 = scalar_lea.hbm %s642_s2, 256 }
  0x18   :  { %s38_s17 = sshll.u32 %s514_s16, 4  ;;  %p438_p8 = scmp.ne.s32.totalorder %s642_s2, %s437_s20  ;;  %s39_s17 = int_to_ptr.vmem [resolvable:$true] %s38_s17 }
  0x19   :  { %p441_p9 = scmp.lt.u32.totalorder %s437_s20, %s642_s2 }
  0x1b   :  { %p443_p10 = pnand %p441_p9, %p438_p8 }
  0x1d   :  { %446 = shalt.err (!%p443_p10)
}
  0x1e   :  { %s447_s25 = scalar_lea.vmem %s39_s17, 256  ;;  %p452_p12 = scmp.lt.s32.totalorder %s39_s17, %s39_s17 }
  0x1f   :  { %p448_p11 = scmp.ne.s32.totalorder %s39_s17, %s447_s25  ;;  %p453_p13 = scmp.lt.s32.totalorder %s447_s25, %s447_s25 }
  0x21   :  { %p454_p0 = por %p453_p13, %p452_p12 }
  0x23   :  { %p455_p1 = pnand %p454_p0, %p448_p11 }
  0x25   :  { %458 = shalt.err (!%p455_p1)
}
  0x26   :  { %s515_s1 = smov 64   ;;  %s516_s26 = smov 4  }
  0x27   :  { %44 = dma.hbm_to_vmem [thread:$0]  %s642_s2, 256, %s39_s17, [#allocation7], %s515_s1, %s515_s1, %s516_s26  }
  0x28   :  { %503 = dma.done.wait [#allocation4], 256  }
  0x29   :  { %504 = vsyncadd [#allocation4], 4294967040 }
  0x2a   :  { %505 = dma.done.wait [#allocation7], 256  }
  0x2b   :  { %506 = vsyncadd [#allocation7], 4294967040  ;;  %v73_v1 = vlaneseq  ;;  %v517_v2 = vmov 0.0   ;;  %vm518_vm0 = vmmov 0   ;;  %v519_v3 = vmov 1966171168  }
  0x2c   :  { %376 = vmatprep.subr.bf16.mxu0 %v517_v2  ;;  %380 = vmatprep.mubr.msk.bf16.mxu0 %vm518_vm0, %v517_v2  ;;  %v71_v4 = vunpack.c.l.s4 %v519_v3  ;;  %v409_v8 = vld [vmem:[#allocation6] sm:$0xff]   ;;  %v410_v10 = vld [vmem:[#allocation6 + $0x8] sm:$0xff]   ;;  %v59_v14 = vld [vmem:[#allocation3] sm:$0xff]  ;;  %vm120_vm1 = vcmask 261120   ;;  %v520_v22 = vmov 0   ;;  %vm226_vm2 = vcmask 1043456  }
  0x2d   :  { %v74_v5 = vshrl.u32 %v73_v1, 7  ;;  %384 = vmatprep.subr.bf16.mxu1 %v517_v2  ;;  %386 = vmatprep.mubr.msk.bf16.mxu1 %vm518_vm0, %v517_v2  ;;  %v360_v11 = vld.sshfl [vmem:[%s640_s0] sm:$0x11 pattern:$0x75316420]  ;;  %v60_v17 = vld [vmem:[#allocation3 + $0x8] sm:$0xff]  ;;  %v213_v38 = vpack.c.bf16 %v59_v14, %v59_v14 }
  0x2e   :  { %v72_v6 = vunpack.c.0.s8 %v71_v4  ;;  %377 = vmatpush3.bf16.msra.mxu0 %v409_v8  ;;  %v69_v12 = vcombine.high %v360_v11, %v360_v11  ;;  %408 = vset.pattern.permute.xlu0 %v520_v22  ;;  %v361_v23 = vld [vmem:[%s643_s3] ss:$0 sm:$0xff]  ;;  %v197_v40 = vand.u32 127, %v73_v1  ;;  %vm206_vm3 = vcmask 1041409   ;;  %s521_s3 = smov [#allocation9]  }
  0x2f   :  { %v86_v9 = vsub.s32 0, %v74_v5  ;;  %378 = vmatprep.subr.bf16.mxu0 %v517_v2  ;;  %v365_v30 = vld [vmem:[%s644_s4] ss:$0 sm:$0xff]  ;;  %v228_v39 = vsel %vm226_vm2, %v213_v38, 0  ;;  %vm209_vm4 = vcmask 58368   ;;  %v214_v52 = vpack.c.bf16 %v60_v17, %v60_v17  ;;  %s346_s4 = sshll.u32 %s521_s3, 4  ;;  %s347_s4 = int_to_ptr.vmem [resolvable:$true] %s346_s4 }
  0x30   :  { %v75_v7 = vsub.s32 %v72_v6, %v74_v5  ;;  %v366_v37 = vld [vmem:[#allocation2] ss:$0 sm:$0xff]  ;;  %385 = vmatpush3.bf16.msra.mxu1 %v228_v39  ;;  %v200_v42 = vsub.s32 %v197_v40, %v74_v5  ;;  %vm222_vm5 = vcmask 64512   ;;  %s459_s10 = scalar_lea.vmem %s347_s4, 32  ;;  %p464_p3 = scmp.lt.s32.totalorder %s347_s4, %s347_s4 }
  0x31   :  { %390 = vmatprep.subr.bf16.mxu1 %v517_v2  ;;  %v281_v57 = vsel %vm226_vm2, %v214_v52, 0  ;;  %p460_p2 = scmp.ne.s32.totalorder %s347_s4, %s459_s10  ;;  %p465_p4 = scmp.lt.s32.totalorder %s459_s10, %s459_s10 }
  0x32   :  { %v76_v13 = vrot.slane %v360_v11, %v75_v7  ;;  %v83_v15 = vrot.slane %v69_v12, %v75_v7  ;;  %379 = vmatpush3.bf16.msra.mxu0 %v410_v10 }
  0x33   :  { %p466_p5 = por %p465_p4, %p464_p3 }
  0x34   :  { %v87_v16 = vrot.slane %v76_v13, %v86_v9  ;;  %v91_v18 = vrot.slane %v83_v15, %v86_v9 }
  0x35   :  { %p467_p6 = pnand %p466_p5, %p460_p2 }
  0x36   :  { %v94_v19 = vadd.f32 %v87_v16, %v59_v14  ;;  %v95_v20 = vadd.f32 %v91_v18, %v60_v17 }
  0x38   :  { %v96_v21 = vpack.c.bf16 %v95_v20, %v94_v19 }
  0x3a   :  { %381 = vmatmul.mubr.msk.bf16.vlgmr.msra.gmra.mrb[0].mxu0 %vm120_vm1, %v96_v21 }
 0x10d   :  { %v158_v24 = vpop.f32.mrb[0].mxu0 }
 0x10e   :  { %v159_v25 = vadd.f32 %v361_v23, %v158_v24  ;;  %v382_v26 = vpop.f32.mrb[1].mxu0 }
 0x10f   :  { %v161_v27 = vpop.f32.mrb[2].mxu0 }
 0x110   :  { %411 = vtanh.f32 %v159_v25  ;;  %v162_v28 = vadd.f32 %v361_v23, %v161_v27  ;;  %v383_v29 = vpop.f32.mrb[3].mxu0 }
 0x112   :  { %413 = vtanh.f32 %v162_v28 }
 0x11a   :  { %v412_v31 = vpop.eup %411 }
 0x11b   :  { %v174_v32 = vmul.f32 %v412_v31, %v365_v30 }
 0x11c   :  { %v414_v33 = vpop.eup %413 }
 0x11d   :  { %v176_v34 = vsel %vm120_vm1, %v174_v32, 0.0  ;;  %v175_v35 = vmul.f32 %v414_v33, %v365_v30 }
 0x11e   :  { %177 = vadd.xlane.f32.xlu0 %v176_v34 }
 0x11f   :  { %v179_v36 = vsel %vm120_vm1, %v175_v35, 0.0 }
 0x120   :  { %180 = vadd.xlane.f32.xlu1 %v179_v36 }
 0x134   :  { %189 = vperm.xlu0 %408, %v366_v37  }
 0x1ab   :  { %v178_v41 = vpop.xlane.xlu0 %177 }
 0x1ad   :  { %v181_v43 = vpop.xlane.xlu1 %180 }
 0x1b3   :  { %v190_v44 = vpop.permute.xlu0 %189 }
 0x1b4   :  { %v192_v45 = vadd.f32 %v190_v44, %v178_v41  ;;  %v193_v46 = vadd.f32 %v190_v44, %v181_v43 }
 0x1b6   :  { %v201_v47 = vrot.slane %v192_v45, %v200_v42  ;;  %v205_v48 = vrot.slane %v193_v46, %v200_v42  ;;  %v211_v49 = vpack.c.bf16 %v192_v45, %v192_v45  ;;  %v212_v50 = vpack.c.bf16 %v193_v46, %v193_v46 }
 0x1b8   :  { %v216_v51 = vunpack.c.l.b16 %v211_v49  ;;  %v207_v53 = vsel %vm206_vm3, %v205_v48, %v201_v47  ;;  %v271_v56 = vunpack.c.l.b16 %v212_v50 }
 0x1b9   :  { %210 = vst.msk [vmem:[#allocation9] sm:$0x3] %vm209_vm4, %v207_v53 }
 0x1ba   :  { %v220_v54 = vrot.slane %v216_v51, %v200_v42  ;;  %v275_v58 = vrot.slane %v271_v56, %v200_v42 }
 0x1bc   :  { %v221_v55 = vpack.c.b16 %v220_v54, %v220_v54  ;;  %v276_v59 = vpack.c.b16 %v275_v58, %v275_v58 }
 0x1be   :  { %387 = vmatmul.mubr.msk.bf16.vlgmr.msra.gmra.mrb[0].mxu1 %vm222_vm5, %v221_v55 }
 0x1bf   :  { %391 = vmatpush3.bf16.msra.mxu1 %v281_v57  ;;  %392 = vmatprep.mubr.msk.bf16.mxu1 %vm518_vm0, %v517_v2 }
 0x1c6   :  { %393 = vmatmul.mubr.msk.bf16.vlgmr.msra.gmra.mrb[4].mxu1 %vm222_vm5, %v276_v59 }
 0x1c7   :  { %470 = shalt.err (!%p467_p6)
}
 0x1c8   :  { %s471_s12 = scalar_lea.hbm %s647_s7, 32 }
 0x1c9   :  { %p472_p7 = scmp.ne.s32.totalorder %s647_s7, %s471_s12  ;;  %p475_p8 = scmp.lt.u32.totalorder %s471_s12, %s647_s7 }
 0x1cb   :  { %p477_p9 = pnand %p475_p8, %p472_p7 }
 0x1cd   :  { %480 = shalt.err (!%p477_p9)
}
 0x1ce   :  { %349 = dma.vmem_to_hbm [thread:$0]  %s347_s4, 32, %s647_s7, [#allocation10]   ;;  %vm328_vm6 = vcmask 254976  }
 0x1cf   :  { %s522_s19 = smov [#allocation8]  }
 0x1d0   :  { %s336_s20 = sshll.u32 %s522_s19, 4  ;;  %s337_s20 = int_to_ptr.vmem [resolvable:$true] %s336_s20 }
 0x1d1   :  { %s481_s21 = scalar_lea.vmem %s337_s20, 32  ;;  %p486_p11 = scmp.lt.s32.totalorder %s337_s20, %s337_s20 }
 0x1d2   :  { %p482_p10 = scmp.ne.s32.totalorder %s337_s20, %s481_s21  ;;  %p487_p12 = scmp.lt.s32.totalorder %s481_s21, %s481_s21 }
 0x1d4   :  { %p488_p13 = por %p487_p12, %p486_p11 }
 0x1d6   :  { %p489_p0 = pnand %p488_p13, %p482_p10 }
 0x291   :  { %v264_v60 = vpop.f32.mrb[0].mxu1 }
 0x292   :  { %v388_v61 = vpop.f32.mrb[1].mxu1 }
 0x293   :  { %v267_v62 = vpop.f32.mrb[2].mxu1 }
 0x294   :  { %v389_v63 = vpop.f32.mrb[3].mxu1 }
 0x299   :  { %v317_v0 = vpop.f32.mrb[4].mxu1 }
 0x29a   :  { %v325_v1 = vrot.slane %v317_v0, 7  ;;  %v394_v2 = vpop.f32.mrb[5].mxu1 }
 0x29b   :  { %v320_v3 = vpop.f32.mrb[6].mxu1 }
 0x29c   :  { %v395_v4 = vpop.f32.mrb[7].mxu1  ;;  %v326_v5 = vsel %vm206_vm3, %v325_v1, %v264_v60 }
 0x29d   :  { %329 = vst.msk [vmem:[#allocation8] sm:$0x3] %vm328_vm6, %v326_v5 }
 0x29e   :  { %492 = shalt.err (!%p489_p0)
}
 0x29f   :  { %s493_s23 = scalar_lea.hbm %s646_s6, 32 }
 0x2a0   :  { %p494_p1 = scmp.ne.s32.totalorder %s646_s6, %s493_s23  ;;  %p497_p2 = scmp.lt.u32.totalorder %s493_s23, %s646_s6 }
 0x2a2   :  { %p499_p3 = pnand %p497_p2, %p494_p1 }
 0x2a4   :  { %502 = shalt.err (!%p499_p3)
}
 0x2a5   :  { %339 = dma.vmem_to_hbm [thread:$0]  %s337_s20, 32, %s646_s6, [#allocation5]  }
 0x2a6   :  { %507 = dma.done.wait [#allocation5], 32  }
 0x2a7   :  { %508 = vsyncadd [#allocation5], 4294967264 }
 0x2a8   :  { %509 = dma.done.wait [#allocation10], 32  }
 0x2a9   :  { %510 = vsyncadd [#allocation10], 4294967264 }
 0x2aa   :  { %356 = vsyncpa [#allocation4], 1 }
 0x2ab   :  { %357 = vsyncpa [#allocation7], 1 }
 0x2ac   :  { %358 = vsyncpa [#allocation5], 1 }
 0x2ad   :  { %359 = vsyncpa [#allocation10], 1 }

</bundles_post_ra>
